<compile_context>
chip_gen: v7x
topology: tpu7x:2x2x1
jax: 0.10.0
libtpu: 0.0.40
codegen_flags: <defaults>
</compile_context>

<pallas_src>
import functools

import jax
import jax.numpy as jnp
from jax import lax
from jax.experimental import pallas as pl
from jax.experimental.pallas import tpu as pltpu


def _skipgram_kernel(tgt_ref,      # SMEM (batch,) int32            -- scalar prefetch (target word ids)
                     ctx_ref,      # VMEM (batch, num_ctx) int32    -- context word ids (transposed)
                     emb_hbm,      # HBM  (emb_size, emb_dim) f32   -- embedding table, memory_space=pl.ANY
                     w_ref,        # VMEM (tile_v, emb_dim) f32     -- vocab tile of Linear weight
                     b_ref,        # VMEM (1, tile_v) f32           -- vocab tile of Linear bias
                     loss_ref,     # VMEM (1, num_ctx) f32          -- per-context NLL, written at last tile
                     emb_vmem,     # scratch VMEM (batch, emb_dim)  -- gathered target embeddings
                     dma_sems,     # scratch DMA sems (batch,)
                     m_acc,        # scratch VMEM (batch, 1) f32    -- running max over vocab
                     s_acc,        # scratch VMEM (batch, 1) f32    -- running sum(exp)
                     g_acc):       # scratch VMEM (batch, num_ctx)  -- gathered context scores
    j = pl.program_id(0)
    tile_v = w_ref.shape[0]
    batch = emb_vmem.shape[0]
    num_ctx = ctx_ref.shape[1]

    # ---- first vocab tile: DMA-gather the embedding rows + init accumulators ----
    @pl.when(j == 0)
    def _():
        copies = []
        for b in range(batch):                          # static loop, batch is small
            cp = pltpu.make_async_copy(
                emb_hbm.at[pl.ds(tgt_ref[b], 1)],       # (1, emb_dim) row in HBM
                emb_vmem.at[pl.ds(b, 1)],               # (1, emb_dim) row in VMEM
                dma_sems.at[b])
            cp.start()
            copies.append(cp)
        for cp in copies:                               # all DMAs in flight, then wait
            cp.wait()
        m_acc[...] = jnp.full_like(m_acc, -jnp.inf)
        s_acc[...] = jnp.zeros_like(s_acc)
        g_acc[...] = jnp.zeros_like(g_acc)

    # ---- score tile: (batch, tile_v) = emb @ W_tile.T + b_tile (MXU) ----
    emb_t = emb_vmem[...]
    score = lax.dot_general(emb_t, w_ref[...], (((1,), (1,)), ((), ())),
                            preferred_element_type=jnp.float32)
    score = score + b_ref[...]

    # ---- online logsumexp over the vocab axis ----
    m_prev = m_acc[...]
    m_new = jnp.maximum(m_prev, jnp.max(score, axis=-1, keepdims=True))
    s_acc[...] = (s_acc[...] * jnp.exp(m_prev - m_new)
                  + jnp.sum(jnp.exp(score - m_new), axis=-1, keepdims=True))
    m_acc[...] = m_new

    # ---- gather the context-word scores that land in this vocab tile ----
    base = j * tile_v
    rel = ctx_ref[...] - base                                           # (batch, num_ctx)
    lane = lax.broadcasted_iota(jnp.int32, (batch, num_ctx, tile_v), 2)
    hit = lane == rel[:, :, None]                                       # (batch, num_ctx, tile_v)
    picked = jnp.sum(jnp.where(hit, score[:, None, :], 0.0), axis=-1)   # (batch, num_ctx)
    g_acc[...] += picked

    # ---- last vocab tile: finalize NLL losses ----
    @pl.when(j == pl.num_programs(0) - 1)
    def _():
        lse = m_acc[...] + jnp.log(s_acc[...])                  # (batch, 1)
        nll = lse - g_acc[...]                                  # (batch, num_ctx)
        loss_ref[...] = jnp.mean(nll, axis=0, keepdims=True)    # (1, num_ctx)


def _pick_tile_v(emb_size, emb_dim, vmem_budget_bytes=8 << 20):
    """Largest vocab tile that divides emb_size and keeps the double-buffered
    weight tile within a modest VMEM budget."""
    for t in (2048, 1024, 512, 256, 128):
        if emb_size % t == 0 and 2 * t * emb_dim * 4 <= vmem_budget_bytes:
            return t
    return emb_size     # fallback: single full-vocab tile


def skip_gram_last_block_losses(tgt, ctx_t, emb_w, out_w, out_b, *, tile_v=None):
    """Per-context NLL losses of the LAST target block, shape (1, num_ctx)."""
    (batch,) = tgt.shape
    _, num_ctx = ctx_t.shape
    emb_size, emb_dim = emb_w.shape
    if tile_v is None:
        tile_v = _pick_tile_v(emb_size, emb_dim)
    assert emb_size % tile_v == 0
    out_b2 = out_b.reshape(1, emb_size)

    return pl.pallas_call(
        _skipgram_kernel,
        out_shape=jax.ShapeDtypeStruct((1, num_ctx), jnp.float32),
        grid_spec=pltpu.PrefetchScalarGridSpec(
            num_scalar_prefetch=1,                       # target indices -> SMEM
            grid=(emb_size // tile_v,),                  # vocab tiles (reduction axis)
            in_specs=[
                pl.BlockSpec((batch, num_ctx), lambda j, tgt: (0, 0)),    # context ids
                pl.BlockSpec(memory_space=pl.ANY),                        # embedding table stays in HBM
                pl.BlockSpec((tile_v, emb_dim), lambda j, tgt: (j, 0)),   # Linear weight vocab tile
                pl.BlockSpec((1, tile_v), lambda j, tgt: (0, j)),         # Linear bias vocab tile
            ],
            out_specs=pl.BlockSpec((1, num_ctx), lambda j, tgt: (0, 0)),
            scratch_shapes=[
                pltpu.VMEM((batch, emb_dim), emb_w.dtype),
                pltpu.SemaphoreType.DMA((batch,)),
                pltpu.VMEM((batch, 1), jnp.float32),
                pltpu.VMEM((batch, 1), jnp.float32),
                pltpu.VMEM((batch, num_ctx), jnp.float32),
            ]),
        compiler_params=pltpu.CompilerParams(
            dimension_semantics=("arbitrary",)),         # vocab axis carries accumulators
    )(tgt, ctx_t, emb_w, out_w, out_b2)


@functools.partial(jax.jit, static_argnames=("tile_v",))
def skip_gram_forward(targets, contexts, emb_w, out_w, out_b, tile_v=None):
    num_blocks = targets.shape[0]
    # Exact PyTorch semantics: only the LAST block's `losses` survives the loop,
    # so we never compute the other blocks.
    tgt = targets[-1, :, 0]                         # (batch,)
    ctx_t = jnp.transpose(contexts[-1, :, :, 0])    # (batch, num_ctx)
    losses = skip_gram_last_block_losses(tgt, ctx_t, emb_w, out_w, out_b, tile_v=tile_v)
    return jnp.mean(losses) / num_blocks


def reference_forward(targets, contexts, emb_w, out_w, out_b):
    """Pure-JAX re-implementation of the PyTorch forward for checking."""
    num_blocks, batch, _ = targets.shape
    losses = None
    for idx in range(num_blocks):
        tgt = targets[idx, :, 0]                           # (batch,)
        emb = emb_w[tgt]                                   # (batch, emb_dim)
        score = emb @ out_w.T + out_b                      # (batch, emb_size)
        logp = jax.nn.log_softmax(score, axis=-1)
        ctx = contexts[idx, :, :, 0]                       # (num_ctx, batch)
        gathered = logp[jnp.arange(batch)[None, :], ctx]   # (num_ctx, batch)
        losses = -jnp.mean(gathered, axis=-1)              # (num_ctx,)
    return jnp.mean(losses) / num_blocks


if __name__ == "__main__":
    key = jax.random.PRNGKey(0)
    emb_size, emb_dim = 256, 128          # vocab size, embedding dimension
    num_blocks, num_ctx, batch = 2, 4, 8  # len(target_blocks), contexts per block, tokens per block

    k1, k2, k3, k4, k5 = jax.random.split(key, 5)
    initrange = 1.0 / emb_dim
    emb_w = jax.random.uniform(k1, (emb_size, emb_dim), jnp.float32, -initrange, initrange)
    bound = 1.0 / (emb_dim ** 0.5)        # PyTorch nn.Linear default init bound
    out_w = jax.random.uniform(k2, (emb_size, emb_dim), jnp.float32, -bound, bound)
    out_b = jax.random.uniform(k3, (emb_size,), jnp.float32, -bound, bound)

    targets = jax.random.randint(k4, (num_blocks, batch, 1), 0, emb_size, dtype=jnp.int32)
    contexts = jax.random.randint(k5, (num_blocks, num_ctx, batch, 1), 0, emb_size, dtype=jnp.int32)

    # tile_v=128 -> 2 vocab tiles, exercising the online-logsumexp accumulation path.
    out = skip_gram_forward(targets, contexts, emb_w, out_w, out_b, tile_v=128)
    out = jax.block_until_ready(out)

    ref = reference_forward(targets, contexts, emb_w, out_w, out_b)
    assert jnp.allclose(out, ref, atol=1e-5, rtol=1e-5), (out, ref)

    print("KERNEL_OK")
</pallas_src>

<mosaic_0001>
module attributes {stable_mosaic.version = 11 : i64} {
  func.func @_skipgram_kernel(%arg0: i32, %arg1: memref<8xi32, #tpu.memory_space<smem>>, %arg2: memref<8x4xi32, #tpu.memory_space<vmem>>, %arg3: memref<256x128xf32, #tpu.memory_space<any>>, %arg4: memref<128x128xf32, #tpu.memory_space<vmem>>, %arg5: memref<1x128xf32, #tpu.memory_space<vmem>>, %arg6: memref<1x4xf32, #tpu.memory_space<vmem>>, %arg7: memref<8x128xf32, #tpu.memory_space<vmem>>, %arg8: memref<8x!tpu.dma_semaphore, #tpu.memory_space<semaphore_mem>>, %arg9: memref<8x1xf32, #tpu.memory_space<vmem>>, %arg10: memref<8x1xf32, #tpu.memory_space<vmem>>, %arg11: memref<8x4xf32, #tpu.memory_space<vmem>>) attributes {dimension_semantics = [#tpu.dimension_semantics<arbitrary>], iteration_bounds = array<i64: 2>, scalar_prefetch = 1 : i64, scratch_operands = 5 : i64, tpu.core_type = #tpu.core_type<tc>, window_params = [{pipeline_mode = #tpu.pipeline_mode<synchronous>, transform_indices = @transform_0, window_bounds = array<i64: 8, 4>}, {}, {transform_indices = @transform_2, window_bounds = array<i64: 128, 128>}, {transform_indices = @transform_3, window_bounds = array<i64: 1, 128>}, {pipeline_mode = #tpu.pipeline_mode<synchronous>, transform_indices = @transform_4, window_bounds = array<i64: 1, 4>}]} {
    %c0_i32 = arith.constant 0 : i32
    %0 = arith.cmpi eq, %arg0, %c0_i32 : i32
    %1 = arith.extui %0 : i1 to i32
    %c0_i32_0 = arith.constant 0 : i32
    %2 = arith.cmpi ne, %1, %c0_i32_0 : i32
    scf.if %2 {
      %c0_25 = arith.constant 0 : index
      %45 = memref.load %arg1[%c0_25] : memref<8xi32, #tpu.memory_space<smem>>
      %c0_i32_26 = arith.constant 0 : i32
      %c0_i32_27 = arith.constant 0 : i32
      %46 = tpu.memref_slice %arg3[%45, %c0_i32_27] : memref<256x128xf32, #tpu.memory_space<any>> -> memref<1x128xf32, #tpu.memory_space<any>>
      %c0_i32_28 = arith.constant 0 : i32
      %c0_i32_29 = arith.constant 0 : i32
      %47 = tpu.memref_slice %arg7[%c0_i32_28, %c0_i32_29] : memref<8x128xf32, #tpu.memory_space<vmem>> -> memref<1x128xf32, #tpu.memory_space<vmem>>
      %48 = tpu.memref_slice %arg8[%c0_i32_26] : memref<8x!tpu.dma_semaphore, #tpu.memory_space<semaphore_mem>> -> memref<1x!tpu.dma_semaphore, #tpu.memory_space<semaphore_mem>>
      %49 = tpu.memref_squeeze %48 : memref<1x!tpu.dma_semaphore, #tpu.memory_space<semaphore_mem>> -> memref<!tpu.dma_semaphore, #tpu.memory_space<semaphore_mem>>
      tpu.enqueue_dma source(%46 : memref<1x128xf32, #tpu.memory_space<any>>) target(%47 : memref<1x128xf32, #tpu.memory_space<vmem>>) target_semaphore(%49 : memref<!tpu.dma_semaphore, #tpu.memory_space<semaphore_mem>>)
      %c1 = arith.constant 1 : index
      %50 = memref.load %arg1[%c1] : memref<8xi32, #tpu.memory_space<smem>>
      %c1_i32_30 = arith.constant 1 : i32
      %c0_i32_31 = arith.constant 0 : i32
      %51 = tpu.memref_slice %arg3[%50, %c0_i32_31] : memref<256x128xf32, #tpu.memory_space<any>> -> memref<1x128xf32, #tpu.memory_space<any>>
      %c1_i32_32 = arith.constant 1 : i32
      %c0_i32_33 = arith.constant 0 : i32
      %52 = tpu.memref_slice %arg7[%c1_i32_32, %c0_i32_33] : memref<8x128xf32, #tpu.memory_space<vmem>> -> memref<1x128xf32, #tpu.memory_space<vmem>>
      %53 = tpu.memref_slice %arg8[%c1_i32_30] : memref<8x!tpu.dma_semaphore, #tpu.memory_space<semaphore_mem>> -> memref<1x!tpu.dma_semaphore, #tpu.memory_space<semaphore_mem>>
      %54 = tpu.memref_squeeze %53 : memref<1x!tpu.dma_semaphore, #tpu.memory_space<semaphore_mem>> -> memref<!tpu.dma_semaphore, #tpu.memory_space<semaphore_mem>>
      tpu.enqueue_dma source(%51 : memref<1x128xf32, #tpu.memory_space<any>>) target(%52 : memref<1x128xf32, #tpu.memory_space<vmem>>) target_semaphore(%54 : memref<!tpu.dma_semaphore, #tpu.memory_space<semaphore_mem>>)
      %c2 = arith.constant 2 : index
      %55 = memref.load %arg1[%c2] : memref<8xi32, #tpu.memory_space<smem>>
      %c2_i32 = arith.constant 2 : i32
      %c0_i32_34 = arith.constant 0 : i32
      %56 = tpu.memref_slice %arg3[%55, %c0_i32_34] : memref<256x128xf32, #tpu.memory_space<any>> -> memref<1x128xf32, #tpu.memory_space<any>>
      %c2_i32_35 = arith.constant 2 : i32
      %c0_i32_36 = arith.constant 0 : i32
      %57 = tpu.memref_slice %arg7[%c2_i32_35, %c0_i32_36] : memref<8x128xf32, #tpu.memory_space<vmem>> -> memref<1x128xf32, #tpu.memory_space<vmem>>
      %58 = tpu.memref_slice %arg8[%c2_i32] : memref<8x!tpu.dma_semaphore, #tpu.memory_space<semaphore_mem>> -> memref<1x!tpu.dma_semaphore, #tpu.memory_space<semaphore_mem>>
      %59 = tpu.memref_squeeze %58 : memref<1x!tpu.dma_semaphore, #tpu.memory_space<semaphore_mem>> -> memref<!tpu.dma_semaphore, #tpu.memory_space<semaphore_mem>>
      tpu.enqueue_dma source(%56 : memref<1x128xf32, #tpu.memory_space<any>>) target(%57 : memref<1x128xf32, #tpu.memory_space<vmem>>) target_semaphore(%59 : memref<!tpu.dma_semaphore, #tpu.memory_space<semaphore_mem>>)
      %c3 = arith.constant 3 : index
      %60 = memref.load %arg1[%c3] : memref<8xi32, #tpu.memory_space<smem>>
      %c3_i32 = arith.constant 3 : i32
      %c0_i32_37 = arith.constant 0 : i32
      %61 = tpu.memref_slice %arg3[%60, %c0_i32_37] : memref<256x128xf32, #tpu.memory_space<any>> -> memref<1x128xf32, #tpu.memory_space<any>>
      %c3_i32_38 = arith.constant 3 : i32
      %c0_i32_39 = arith.constant 0 : i32
      %62 = tpu.memref_slice %arg7[%c3_i32_38, %c0_i32_39] : memref<8x128xf32, #tpu.memory_space<vmem>> -> memref<1x128xf32, #tpu.memory_space<vmem>>
      %63 = tpu.memref_slice %arg8[%c3_i32] : memref<8x!tpu.dma_semaphore, #tpu.memory_space<semaphore_mem>> -> memref<1x!tpu.dma_semaphore, #tpu.memory_space<semaphore_mem>>
      %64 = tpu.memref_squeeze %63 : memref<1x!tpu.dma_semaphore, #tpu.memory_space<semaphore_mem>> -> memref<!tpu.dma_semaphore, #tpu.memory_space<semaphore_mem>>
      tpu.enqueue_dma source(%61 : memref<1x128xf32, #tpu.memory_space<any>>) target(%62 : memref<1x128xf32, #tpu.memory_space<vmem>>) target_semaphore(%64 : memref<!tpu.dma_semaphore, #tpu.memory_space<semaphore_mem>>)
      %c4 = arith.constant 4 : index
      %65 = memref.load %arg1[%c4] : memref<8xi32, #tpu.memory_space<smem>>
      %c4_i32 = arith.constant 4 : i32
      %c0_i32_40 = arith.constant 0 : i32
      %66 = tpu.memref_slice %arg3[%65, %c0_i32_40] : memref<256x128xf32, #tpu.memory_space<any>> -> memref<1x128xf32, #tpu.memory_space<any>>
      %c4_i32_41 = arith.constant 4 : i32
      %c0_i32_42 = arith.constant 0 : i32
      %67 = tpu.memref_slice %arg7[%c4_i32_41, %c0_i32_42] : memref<8x128xf32, #tpu.memory_space<vmem>> -> memref<1x128xf32, #tpu.memory_space<vmem>>
      %68 = tpu.memref_slice %arg8[%c4_i32] : memref<8x!tpu.dma_semaphore, #tpu.memory_space<semaphore_mem>> -> memref<1x!tpu.dma_semaphore, #tpu.memory_space<semaphore_mem>>
      %69 = tpu.memref_squeeze %68 : memref<1x!tpu.dma_semaphore, #tpu.memory_space<semaphore_mem>> -> memref<!tpu.dma_semaphore, #tpu.memory_space<semaphore_mem>>
      tpu.enqueue_dma source(%66 : memref<1x128xf32, #tpu.memory_space<any>>) target(%67 : memref<1x128xf32, #tpu.memory_space<vmem>>) target_semaphore(%69 : memref<!tpu.dma_semaphore, #tpu.memory_space<semaphore_mem>>)
      %c5 = arith.constant 5 : index
      %70 = memref.load %arg1[%c5] : memref<8xi32, #tpu.memory_space<smem>>
      %c5_i32 = arith.constant 5 : i32
      %c0_i32_43 = arith.constant 0 : i32
      %71 = tpu.memref_slice %arg3[%70, %c0_i32_43] : memref<256x128xf32, #tpu.memory_space<any>> -> memref<1x128xf32, #tpu.memory_space<any>>
      %c5_i32_44 = arith.constant 5 : i32
      %c0_i32_45 = arith.constant 0 : i32
      %72 = tpu.memref_slice %arg7[%c5_i32_44, %c0_i32_45] : memref<8x128xf32, #tpu.memory_space<vmem>> -> memref<1x128xf32, #tpu.memory_space<vmem>>
      %73 = tpu.memref_slice %arg8[%c5_i32] : memref<8x!tpu.dma_semaphore, #tpu.memory_space<semaphore_mem>> -> memref<1x!tpu.dma_semaphore, #tpu.memory_space<semaphore_mem>>
      %74 = tpu.memref_squeeze %73 : memref<1x!tpu.dma_semaphore, #tpu.memory_space<semaphore_mem>> -> memref<!tpu.dma_semaphore, #tpu.memory_space<semaphore_mem>>
      tpu.enqueue_dma source(%71 : memref<1x128xf32, #tpu.memory_space<any>>) target(%72 : memref<1x128xf32, #tpu.memory_space<vmem>>) target_semaphore(%74 : memref<!tpu.dma_semaphore, #tpu.memory_space<semaphore_mem>>)
      %c6 = arith.constant 6 : index
      %75 = memref.load %arg1[%c6] : memref<8xi32, #tpu.memory_space<smem>>
      %c6_i32 = arith.constant 6 : i32
      %c0_i32_46 = arith.constant 0 : i32
      %76 = tpu.memref_slice %arg3[%75, %c0_i32_46] : memref<256x128xf32, #tpu.memory_space<any>> -> memref<1x128xf32, #tpu.memory_space<any>>
      %c6_i32_47 = arith.constant 6 : i32
      %c0_i32_48 = arith.constant 0 : i32
      %77 = tpu.memref_slice %arg7[%c6_i32_47, %c0_i32_48] : memref<8x128xf32, #tpu.memory_space<vmem>> -> memref<1x128xf32, #tpu.memory_space<vmem>>
      %78 = tpu.memref_slice %arg8[%c6_i32] : memref<8x!tpu.dma_semaphore, #tpu.memory_space<semaphore_mem>> -> memref<1x!tpu.dma_semaphore, #tpu.memory_space<semaphore_mem>>
      %79 = tpu.memref_squeeze %78 : memref<1x!tpu.dma_semaphore, #tpu.memory_space<semaphore_mem>> -> memref<!tpu.dma_semaphore, #tpu.memory_space<semaphore_mem>>
      tpu.enqueue_dma source(%76 : memref<1x128xf32, #tpu.memory_space<any>>) target(%77 : memref<1x128xf32, #tpu.memory_space<vmem>>) target_semaphore(%79 : memref<!tpu.dma_semaphore, #tpu.memory_space<semaphore_mem>>)
      %c7 = arith.constant 7 : index
      %80 = memref.load %arg1[%c7] : memref<8xi32, #tpu.memory_space<smem>>
      %c7_i32 = arith.constant 7 : i32
      %c0_i32_49 = arith.constant 0 : i32
      %81 = tpu.memref_slice %arg3[%80, %c0_i32_49] : memref<256x128xf32, #tpu.memory_space<any>> -> memref<1x128xf32, #tpu.memory_space<any>>
      %c7_i32_50 = arith.constant 7 : i32
      %c0_i32_51 = arith.constant 0 : i32
      %82 = tpu.memref_slice %arg7[%c7_i32_50, %c0_i32_51] : memref<8x128xf32, #tpu.memory_space<vmem>> -> memref<1x128xf32, #tpu.memory_space<vmem>>
      %83 = tpu.memref_slice %arg8[%c7_i32] : memref<8x!tpu.dma_semaphore, #tpu.memory_space<semaphore_mem>> -> memref<1x!tpu.dma_semaphore, #tpu.memory_space<semaphore_mem>>
      %84 = tpu.memref_squeeze %83 : memref<1x!tpu.dma_semaphore, #tpu.memory_space<semaphore_mem>> -> memref<!tpu.dma_semaphore, #tpu.memory_space<semaphore_mem>>
      tpu.enqueue_dma source(%81 : memref<1x128xf32, #tpu.memory_space<any>>) target(%82 : memref<1x128xf32, #tpu.memory_space<vmem>>) target_semaphore(%84 : memref<!tpu.dma_semaphore, #tpu.memory_space<semaphore_mem>>)
      %c0_i32_52 = arith.constant 0 : i32
      %c0_i32_53 = arith.constant 0 : i32
      %85 = tpu.memref_slice %arg3[%45, %c0_i32_53] : memref<256x128xf32, #tpu.memory_space<any>> -> memref<1x128xf32, #tpu.memory_space<any>>
      %c0_i32_54 = arith.constant 0 : i32
      %c0_i32_55 = arith.constant 0 : i32
      %86 = tpu.memref_slice %arg7[%c0_i32_54, %c0_i32_55] : memref<8x128xf32, #tpu.memory_space<vmem>> -> memref<1x128xf32, #tpu.memory_space<vmem>>
      %87 = tpu.memref_slice %arg8[%c0_i32_52] : memref<8x!tpu.dma_semaphore, #tpu.memory_space<semaphore_mem>> -> memref<1x!tpu.dma_semaphore, #tpu.memory_space<semaphore_mem>>
      %88 = tpu.memref_squeeze %87 : memref<1x!tpu.dma_semaphore, #tpu.memory_space<semaphore_mem>> -> memref<!tpu.dma_semaphore, #tpu.memory_space<semaphore_mem>>
      tpu.wait_dma2 semaphore(%88 : memref<!tpu.dma_semaphore, #tpu.memory_space<semaphore_mem>>) src(%85 : memref<1x128xf32, #tpu.memory_space<any>>) dst(%86 : memref<1x128xf32, #tpu.memory_space<vmem>>)
      %c1_i32_56 = arith.constant 1 : i32
      %c0_i32_57 = arith.constant 0 : i32
      %89 = tpu.memref_slice %arg3[%50, %c0_i32_57] : memref<256x128xf32, #tpu.memory_space<any>> -> memref<1x128xf32, #tpu.memory_space<any>>
      %c1_i32_58 = arith.constant 1 : i32
      %c0_i32_59 = arith.constant 0 : i32
      %90 = tpu.memref_slice %arg7[%c1_i32_58, %c0_i32_59] : memref<8x128xf32, #tpu.memory_space<vmem>> -> memref<1x128xf32, #tpu.memory_space<vmem>>
      %91 = tpu.memref_slice %arg8[%c1_i32_56] : memref<8x!tpu.dma_semaphore, #tpu.memory_space<semaphore_mem>> -> memref<1x!tpu.dma_semaphore, #tpu.memory_space<semaphore_mem>>
      %92 = tpu.memref_squeeze %91 : memref<1x!tpu.dma_semaphore, #tpu.memory_space<semaphore_mem>> -> memref<!tpu.dma_semaphore, #tpu.memory_space<semaphore_mem>>
      tpu.wait_dma2 semaphore(%92 : memref<!tpu.dma_semaphore, #tpu.memory_space<semaphore_mem>>) src(%89 : memref<1x128xf32, #tpu.memory_space<any>>) dst(%90 : memref<1x128xf32, #tpu.memory_space<vmem>>)
      %c2_i32_60 = arith.constant 2 : i32
      %c0_i32_61 = arith.constant 0 : i32
      %93 = tpu.memref_slice %arg3[%55, %c0_i32_61] : memref<256x128xf32, #tpu.memory_space<any>> -> memref<1x128xf32, #tpu.memory_space<any>>
      %c2_i32_62 = arith.constant 2 : i32
      %c0_i32_63 = arith.constant 0 : i32
      %94 = tpu.memref_slice %arg7[%c2_i32_62, %c0_i32_63] : memref<8x128xf32, #tpu.memory_space<vmem>> -> memref<1x128xf32, #tpu.memory_space<vmem>>
      %95 = tpu.memref_slice %arg8[%c2_i32_60] : memref<8x!tpu.dma_semaphore, #tpu.memory_space<semaphore_mem>> -> memref<1x!tpu.dma_semaphore, #tpu.memory_space<semaphore_mem>>
      %96 = tpu.memref_squeeze %95 : memref<1x!tpu.dma_semaphore, #tpu.memory_space<semaphore_mem>> -> memref<!tpu.dma_semaphore, #tpu.memory_space<semaphore_mem>>
      tpu.wait_dma2 semaphore(%96 : memref<!tpu.dma_semaphore, #tpu.memory_space<semaphore_mem>>) src(%93 : memref<1x128xf32, #tpu.memory_space<any>>) dst(%94 : memref<1x128xf32, #tpu.memory_space<vmem>>)
      %c3_i32_64 = arith.constant 3 : i32
      %c0_i32_65 = arith.constant 0 : i32
      %97 = tpu.memref_slice %arg3[%60, %c0_i32_65] : memref<256x128xf32, #tpu.memory_space<any>> -> memref<1x128xf32, #tpu.memory_space<any>>
      %c3_i32_66 = arith.constant 3 : i32
      %c0_i32_67 = arith.constant 0 : i32
      %98 = tpu.memref_slice %arg7[%c3_i32_66, %c0_i32_67] : memref<8x128xf32, #tpu.memory_space<vmem>> -> memref<1x128xf32, #tpu.memory_space<vmem>>
      %99 = tpu.memref_slice %arg8[%c3_i32_64] : memref<8x!tpu.dma_semaphore, #tpu.memory_space<semaphore_mem>> -> memref<1x!tpu.dma_semaphore, #tpu.memory_space<semaphore_mem>>
      %100 = tpu.memref_squeeze %99 : memref<1x!tpu.dma_semaphore, #tpu.memory_space<semaphore_mem>> -> memref<!tpu.dma_semaphore, #tpu.memory_space<semaphore_mem>>
      tpu.wait_dma2 semaphore(%100 : memref<!tpu.dma_semaphore, #tpu.memory_space<semaphore_mem>>) src(%97 : memref<1x128xf32, #tpu.memory_space<any>>) dst(%98 : memref<1x128xf32, #tpu.memory_space<vmem>>)
      %c4_i32_68 = arith.constant 4 : i32
      %c0_i32_69 = arith.constant 0 : i32
      %101 = tpu.memref_slice %arg3[%65, %c0_i32_69] : memref<256x128xf32, #tpu.memory_space<any>> -> memref<1x128xf32, #tpu.memory_space<any>>
      %c4_i32_70 = arith.constant 4 : i32
      %c0_i32_71 = arith.constant 0 : i32
      %102 = tpu.memref_slice %arg7[%c4_i32_70, %c0_i32_71] : memref<8x128xf32, #tpu.memory_space<vmem>> -> memref<1x128xf32, #tpu.memory_space<vmem>>
      %103 = tpu.memref_slice %arg8[%c4_i32_68] : memref<8x!tpu.dma_semaphore, #tpu.memory_space<semaphore_mem>> -> memref<1x!tpu.dma_semaphore, #tpu.memory_space<semaphore_mem>>
      %104 = tpu.memref_squeeze %103 : memref<1x!tpu.dma_semaphore, #tpu.memory_space<semaphore_mem>> -> memref<!tpu.dma_semaphore, #tpu.memory_space<semaphore_mem>>
      tpu.wait_dma2 semaphore(%104 : memref<!tpu.dma_semaphore, #tpu.memory_space<semaphore_mem>>) src(%101 : memref<1x128xf32, #tpu.memory_space<any>>) dst(%102 : memref<1x128xf32, #tpu.memory_space<vmem>>)
      %c5_i32_72 = arith.constant 5 : i32
      %c0_i32_73 = arith.constant 0 : i32
      %105 = tpu.memref_slice %arg3[%70, %c0_i32_73] : memref<256x128xf32, #tpu.memory_space<any>> -> memref<1x128xf32, #tpu.memory_space<any>>
      %c5_i32_74 = arith.constant 5 : i32
      %c0_i32_75 = arith.constant 0 : i32
      %106 = tpu.memref_slice %arg7[%c5_i32_74, %c0_i32_75] : memref<8x128xf32, #tpu.memory_space<vmem>> -> memref<1x128xf32, #tpu.memory_space<vmem>>
      %107 = tpu.memref_slice %arg8[%c5_i32_72] : memref<8x!tpu.dma_semaphore, #tpu.memory_space<semaphore_mem>> -> memref<1x!tpu.dma_semaphore, #tpu.memory_space<semaphore_mem>>
      %108 = tpu.memref_squeeze %107 : memref<1x!tpu.dma_semaphore, #tpu.memory_space<semaphore_mem>> -> memref<!tpu.dma_semaphore, #tpu.memory_space<semaphore_mem>>
      tpu.wait_dma2 semaphore(%108 : memref<!tpu.dma_semaphore, #tpu.memory_space<semaphore_mem>>) src(%105 : memref<1x128xf32, #tpu.memory_space<any>>) dst(%106 : memref<1x128xf32, #tpu.memory_space<vmem>>)
      %c6_i32_76 = arith.constant 6 : i32
      %c0_i32_77 = arith.constant 0 : i32
      %109 = tpu.memref_slice %arg3[%75, %c0_i32_77] : memref<256x128xf32, #tpu.memory_space<any>> -> memref<1x128xf32, #tpu.memory_space<any>>
      %c6_i32_78 = arith.constant 6 : i32
      %c0_i32_79 = arith.constant 0 : i32
      %110 = tpu.memref_slice %arg7[%c6_i32_78, %c0_i32_79] : memref<8x128xf32, #tpu.memory_space<vmem>> -> memref<1x128xf32, #tpu.memory_space<vmem>>
      %111 = tpu.memref_slice %arg8[%c6_i32_76] : memref<8x!tpu.dma_semaphore, #tpu.memory_space<semaphore_mem>> -> memref<1x!tpu.dma_semaphore, #tpu.memory_space<semaphore_mem>>
      %112 = tpu.memref_squeeze %111 : memref<1x!tpu.dma_semaphore, #tpu.memory_space<semaphore_mem>> -> memref<!tpu.dma_semaphore, #tpu.memory_space<semaphore_mem>>
      tpu.wait_dma2 semaphore(%112 : memref<!tpu.dma_semaphore, #tpu.memory_space<semaphore_mem>>) src(%109 : memref<1x128xf32, #tpu.memory_space<any>>) dst(%110 : memref<1x128xf32, #tpu.memory_space<vmem>>)
      %c7_i32_80 = arith.constant 7 : i32
      %c0_i32_81 = arith.constant 0 : i32
      %113 = tpu.memref_slice %arg3[%80, %c0_i32_81] : memref<256x128xf32, #tpu.memory_space<any>> -> memref<1x128xf32, #tpu.memory_space<any>>
      %c7_i32_82 = arith.constant 7 : i32
      %c0_i32_83 = arith.constant 0 : i32
      %114 = tpu.memref_slice %arg7[%c7_i32_82, %c0_i32_83] : memref<8x128xf32, #tpu.memory_space<vmem>> -> memref<1x128xf32, #tpu.memory_space<vmem>>
      %115 = tpu.memref_slice %arg8[%c7_i32_80] : memref<8x!tpu.dma_semaphore, #tpu.memory_space<semaphore_mem>> -> memref<1x!tpu.dma_semaphore, #tpu.memory_space<semaphore_mem>>
      %116 = tpu.memref_squeeze %115 : memref<1x!tpu.dma_semaphore, #tpu.memory_space<semaphore_mem>> -> memref<!tpu.dma_semaphore, #tpu.memory_space<semaphore_mem>>
      tpu.wait_dma2 semaphore(%116 : memref<!tpu.dma_semaphore, #tpu.memory_space<semaphore_mem>>) src(%113 : memref<1x128xf32, #tpu.memory_space<any>>) dst(%114 : memref<1x128xf32, #tpu.memory_space<vmem>>)
      %cst_84 = arith.constant 0xFF800000 : f32
      %117 = vector.broadcast %cst_84 : f32 to vector<8x1xf32>
      %c0_85 = arith.constant 0 : index
      %c0_86 = arith.constant 0 : index
      %118 = vector.load %arg9[%c0_85, %c0_86] : memref<8x1xf32, #tpu.memory_space<vmem>>, vector<8x1xf32>
      tpu.vector_store %arg9[%c0_85, %c0_86], %117 {strides = array<i32>} : memref<8x1xf32, #tpu.memory_space<vmem>>, vector<8x1xf32>,
      %cst_87 = arith.constant 0.000000e+00 : f32
      %119 = vector.broadcast %cst_87 : f32 to vector<8x1xf32>
      %c0_88 = arith.constant 0 : index
      %c0_89 = arith.constant 0 : index
      %120 = vector.load %arg10[%c0_88, %c0_89] : memref<8x1xf32, #tpu.memory_space<vmem>>, vector<8x1xf32>
      tpu.vector_store %arg10[%c0_88, %c0_89], %119 {strides = array<i32>} : memref<8x1xf32, #tpu.memory_space<vmem>>, vector<8x1xf32>,
      %cst_90 = arith.constant 0.000000e+00 : f32
      %121 = vector.broadcast %cst_90 : f32 to vector<8x4xf32>
      %c0_91 = arith.constant 0 : index
      %c0_92 = arith.constant 0 : index
      %122 = vector.load %arg11[%c0_91, %c0_92] : memref<8x4xf32, #tpu.memory_space<vmem>>, vector<8x4xf32>
      tpu.vector_store %arg11[%c0_91, %c0_92], %121 {strides = array<i32>} : memref<8x4xf32, #tpu.memory_space<vmem>>, vector<8x4xf32>,
    } else {
    }
    %c0 = arith.constant 0 : index
    %c0_1 = arith.constant 0 : index
    %3 = vector.load %arg7[%c0, %c0_1] : memref<8x128xf32, #tpu.memory_space<vmem>>, vector<8x128xf32>
    %c0_2 = arith.constant 0 : index
    %c0_3 = arith.constant 0 : index
    %4 = vector.load %arg4[%c0_2, %c0_3] : memref<128x128xf32, #tpu.memory_space<vmem>>, vector<128x128xf32>
    %cst = arith.constant dense<0.000000e+00> : vector<8x128xf32>
    %5 = tpu.matmul %3, %4, %cst {dimension_numbers = #tpu.dot_dimension_numbers<[1], [1], [0], [0], [0, 0, 1, 0], [], []>} : vector<8x128xf32>, vector<128x128xf32>, vector<8x128xf32> -> vector<8x128xf32>
    %c0_4 = arith.constant 0 : index
    %c0_5 = arith.constant 0 : index
    %6 = vector.load %arg5[%c0_4, %c0_5] : memref<1x128xf32, #tpu.memory_space<vmem>>, vector<1x128xf32>
    %7 = vector.broadcast %6 : vector<1x128xf32> to vector<8x128xf32>
    %8 = arith.addf %5, %7 : vector<8x128xf32>
    %c0_6 = arith.constant 0 : index
    %c0_7 = arith.constant 0 : index
    %9 = vector.load %arg9[%c0_6, %c0_7] : memref<8x1xf32, #tpu.memory_space<vmem>>, vector<8x1xf32>
    %cst_8 = arith.constant dense<0xFF800000> : vector<8xf32>
    %10 = vector.multi_reduction <maximumf>, %8, %cst_8 [1] : vector<8x128xf32> to vector<8xf32>
    %11 = vector.shape_cast %10 : vector<8xf32> to vector<8x1xf32>
    %12 = arith.maximumf %9, %11 : vector<8x1xf32>
    %c0_9 = arith.constant 0 : index
    %c0_10 = arith.constant 0 : index
    %13 = vector.load %arg10[%c0_9, %c0_10] : memref<8x1xf32, #tpu.memory_space<vmem>>, vector<8x1xf32>
    %14 = arith.subf %9, %12 : vector<8x1xf32>
    %15 = math.exp %14 : vector<8x1xf32>
    %16 = arith.mulf %13, %15 : vector<8x1xf32>
    %17 = vector.broadcast %12 : vector<8x1xf32> to vector<8x128xf32>
    %18 = arith.subf %8, %17 : vector<8x128xf32>
    %19 = math.exp %18 : vector<8x128xf32>
    %cst_11 = arith.constant dense<0.000000e+00> : vector<8xf32>
    %20 = vector.multi_reduction <add>, %19, %cst_11 [1] : vector<8x128xf32> to vector<8xf32>
    %21 = vector.shape_cast %20 : vector<8xf32> to vector<8x1xf32>
    %22 = arith.addf %16, %21 : vector<8x1xf32>
    %c0_12 = arith.constant 0 : index
    %c0_13 = arith.constant 0 : index
    %23 = vector.load %arg10[%c0_12, %c0_13] : memref<8x1xf32, #tpu.memory_space<vmem>>, vector<8x1xf32>
    tpu.vector_store %arg10[%c0_12, %c0_13], %22 {strides = array<i32>} : memref<8x1xf32, #tpu.memory_space<vmem>>, vector<8x1xf32>,
    %c0_14 = arith.constant 0 : index
    %c0_15 = arith.constant 0 : index
    %24 = vector.load %arg9[%c0_14, %c0_15] : memref<8x1xf32, #tpu.memory_space<vmem>>, vector<8x1xf32>
    tpu.vector_store %arg9[%c0_14, %c0_15], %12 {strides = array<i32>} : memref<8x1xf32, #tpu.memory_space<vmem>>, vector<8x1xf32>,
    %c128_i32 = arith.constant 128 : i32
    %25 = arith.muli %arg0, %c128_i32 : i32
    %c0_16 = arith.constant 0 : index
    %c0_17 = arith.constant 0 : index
    %26 = vector.load %arg2[%c0_16, %c0_17] : memref<8x4xi32, #tpu.memory_space<vmem>>, vector<8x4xi32>
    %27 = vector.broadcast %25 : i32 to vector<8x4xi32>
    %28 = arith.subi %26, %27 : vector<8x4xi32>
    %29 = tpu.iota {dimensions = array<i32: 2>} : vector<8x4x128xi32>
    %30 = vector.shape_cast %28 : vector<8x4xi32> to vector<8x4x1xi32>
    %31 = vector.broadcast %30 : vector<8x4x1xi32> to vector<8x4x128xi32>
    %32 = arith.cmpi eq, %29, %31 : vector<8x4x128xi32>
    %33 = vector.shape_cast %8 : vector<8x128xf32> to vector<8x1x128xf32>
    %cst_18 = arith.constant 0.000000e+00 : f32
    %34 = vector.shape_cast %33 : vector<8x1x128xf32> to vector<8x1x128xf32>
    %35 = vector.broadcast %34 : vector<8x1x128xf32> to vector<8x4x128xf32>
    %36 = vector.broadcast %cst_18 : f32 to vector<8x4x128xf32>
    %37 = arith.select %32, %35, %36 : vector<8x4x128xi1>, vector<8x4x128xf32>
    %cst_19 = arith.constant dense<0.000000e+00> : vector<8x4xf32>
    %38 = vector.multi_reduction <add>, %37, %cst_19 [2] : vector<8x4x128xf32> to vector<8x4xf32>
    %c0_20 = arith.constant 0 : index
    %c0_21 = arith.constant 0 : index
    %39 = vector.load %arg11[%c0_20, %c0_21] : memref<8x4xf32, #tpu.memory_space<vmem>>, vector<8x4xf32>
    %40 = arith.addf %39, %38 : vector<8x4xf32>
    %c0_22 = arith.constant 0 : index
    %c0_23 = arith.constant 0 : index
    %41 = vector.load %arg11[%c0_22, %c0_23] : memref<8x4xf32, #tpu.memory_space<vmem>>, vector<8x4xf32>
    tpu.vector_store %arg11[%c0_22, %c0_23], %40 {strides = array<i32>} : memref<8x4xf32, #tpu.memory_space<vmem>>, vector<8x4xf32>,
    %c1_i32 = arith.constant 1 : i32
    %42 = arith.cmpi eq, %arg0, %c1_i32 : i32
    %43 = arith.extui %42 : i1 to i32
    %c0_i32_24 = arith.constant 0 : i32
    %44 = arith.cmpi ne, %43, %c0_i32_24 : i32
    scf.if %44 {
      %c0_25 = arith.constant 0 : index
      %c0_26 = arith.constant 0 : index
      %45 = vector.load %arg9[%c0_25, %c0_26] : memref<8x1xf32, #tpu.memory_space<vmem>>, vector<8x1xf32>
      %c0_27 = arith.constant 0 : index
      %c0_28 = arith.constant 0 : index
      %46 = vector.load %arg10[%c0_27, %c0_28] : memref<8x1xf32, #tpu.memory_space<vmem>>, vector<8x1xf32>
      %47 = math.log %46 : vector<8x1xf32>
      %48 = arith.addf %45, %47 : vector<8x1xf32>
      %c0_29 = arith.constant 0 : index
      %c0_30 = arith.constant 0 : index
      %49 = vector.load %arg11[%c0_29, %c0_30] : memref<8x4xf32, #tpu.memory_space<vmem>>, vector<8x4xf32>
      %50 = vector.broadcast %48 : vector<8x1xf32> to vector<8x4xf32>
      %51 = arith.subf %50, %49 : vector<8x4xf32>
      %cst_31 = arith.constant dense<0.000000e+00> : vector<4xf32>
      %52 = vector.multi_reduction <add>, %51, %cst_31 [0] : vector<8x4xf32> to vector<4xf32>
      %53 = vector.shape_cast %52 : vector<4xf32> to vector<1x4xf32>
      %cst_32 = arith.constant 8.000000e+00 : f32
      %54 = vector.broadcast %cst_32 : f32 to vector<1x4xf32>
      %55 = arith.divf %53, %54 : vector<1x4xf32>
      %c0_33 = arith.constant 0 : index
      %c0_34 = arith.constant 0 : index
      %56 = vector.load %arg6[%c0_33, %c0_34] : memref<1x4xf32, #tpu.memory_space<vmem>>, vector<1x4xf32>
      tpu.vector_store %arg6[%c0_33, %c0_34], %55 {strides = array<i32>} : memref<1x4xf32, #tpu.memory_space<vmem>>, vector<1x4xf32>,
    } else {
    }
    return
  }
  func.func @transform_0(%arg0: i32, %arg1: memref<8xi32, #tpu.memory_space<smem>>) -> (i32, i32) {
    %c0_i32 = arith.constant 0 : i32
    %c0_i32_0 = arith.constant 0 : i32
    %c0_i32_1 = arith.constant 0 : i32
    return %c0_i32, %c0_i32_0 : i32, i32
  }
  func.func @transform_2(%arg0: i32, %arg1: memref<8xi32, #tpu.memory_space<smem>>) -> (i32, i32) {
    %c0_i32 = arith.constant 0 : i32
    %c0_i32_0 = arith.constant 0 : i32
    return %arg0, %c0_i32 : i32, i32
  }
  func.func @transform_3(%arg0: i32, %arg1: memref<8xi32, #tpu.memory_space<smem>>) -> (i32, i32) {
    %c0_i32 = arith.constant 0 : i32
    %c0_i32_0 = arith.constant 0 : i32
    return %c0_i32, %arg0 : i32, i32
  }
  func.func @transform_4(%arg0: i32, %arg1: memref<8xi32, #tpu.memory_space<smem>>) -> (i32, i32) {
    %c0_i32 = arith.constant 0 : i32
    %c0_i32_0 = arith.constant 0 : i32
    %c0_i32_1 = arith.constant 0 : i32
    return %c0_i32, %c0_i32_0 : i32, i32
  }
}

</mosaic_0001>

<bundles_post_ra>
// kernel: skip_gram_forward.1
= control target key start
LH: loop header
LB: loop body
LE: loop exit
PB: predicated region body
PF: predicated region fallthrough
CT: control target
= control target key end

     0   :  { %s1721_s0 = inlined_call_operand.vmem [shape: s32[8], index: 0, kind: input, shape index: {}]   ;;  %s1722_s1 = inlined_call_operand.vmem [shape: s32[8,4], index: 1, kind: input, shape index: {}]   ;;  %s1723_s2 = inlined_call_operand.hbm [shape: f32[256,128], index: 2, kind: input, shape index: {}]   ;;  %s1724_s3 = inlined_call_operand.hbm [shape: f32[256,128], index: 3, kind: input, shape index: {}]   ;;  %s1725_s4 = inlined_call_operand.vmem [shape: f32[1,256], index: 4, kind: input, shape index: {}]   ;;  %s1726_s5 = inlined_call_operand.vmem [shape: f32[1,4], index: 5, kind: output, shape index: {}]  }
   0x1   :  { %s10_s20 = sshll.u32 %s1721_s0, 4  ;;  %s11_s20 = int_to_ptr.vmem [resolvable:$true] %s10_s20 }
   0x2   :  { %s1046_s21 = scalar_lea.vmem %s11_s20, 16  ;;  %p1051_p1 = scmp.lt.s32.totalorder %s11_s20, %s11_s20 }
   0x3   :  { %p1047_p0 = scmp.ne.s32.totalorder %s11_s20, %s1046_s21  ;;  %p1052_p2 = scmp.lt.s32.totalorder %s1046_s21, %s1046_s21 }
   0x5   :  { %p1053_p3 = por %p1052_p2, %p1051_p1 }
   0x7   :  { %p1054_p4 = pnand %p1053_p3, %p1047_p0 }
   0x9   :  { %1057 = shalt.err (!%p1054_p4)  }
   0xa   :  { %s1334_s22 = smov [#allocation8]  }
   0xb   :  { %13 = dma.vmem_to_smem %s11_s20, 16, %s1334_s22, [#allocation7] }
   0xc   :  { %1296 = dma.done.wait [#allocation7], 16 }
   0xd   :  { %1297 = vsyncadd [#allocation7], 4294967280 }
   0xe   :  { %15 = sfence }
   0xf   :  { %16 = vsyncpa [#allocation10], 0 }
  0x10   :  { %18 = vsyncpa [#allocation10 + $0x1], 0  ;;  %s1387_s23 = smov 0   ;;  %s1389_s24 = smov 0  }
  0x11   :  { %s1391_s0 = smov 0   ;;  %s1393_s25 = smov 0  }
  0x12 LB: > { %s1406_s26 = sadd.s32 4294967295, %s1332_s25   ;;  %s1409_s27 = sadd.s32 1, %s1332_s25   ;;  %s1332_s25 = sphi %s1393_s25, %s1734_s25   ;;  %s1328_s0 = sphi %s1391_s0, %s1733_s0   ;;  %s1324_s24 = sphi %s1389_s24, %s1732_s24   ;;  %s1320_s23 = sphi %s1387_s23, %s1731_s23  }
  0x13   : > { %s49_s28 = ssub.s32 %s1332_s25, %s1409_s27  ;;  %s52_s29 = sadd.s32 1, %s1328_s0 }
  0x14   : > { %p50_p5 = scmp.eq.s32.totalorder %s49_s28, 0  ;;  %p59_p6 = scmp.ne.s32.totalorder %s1328_s0, %s1324_s24 }
  0x15   : > { %p60_p7 = scmp.eq.s32.totalorder %s1332_s25, 0  ;;  %p65_p8 = scmp.ne.s32.totalorder %s1324_s24, %s1320_s23 }
  0x16   : > { %s1419_s30 = scalar_select %p50_p5, %s1328_s0, %s52_s29  }
  0x17   : > { %p61_p9 = por %p60_p7, %p59_p6  ;;  %p66_p10 = scmp.eq.s32.totalorder %s1406_s26, 0 }
  0x18   : > { %p986_p11 = scmp.lt.s32.totalorder %s1332_s25, 2  ;;  %s139_s7 = sand.u32 1, %s1328_s0  }
  0x19   : > { %p1423_p12 = por %p66_p10, %p65_p8  ;;  %s869_s8 = sshll.u32 %s139_s7, 7 }
  0x1a   : > { %s903_s9 = sshll.u32 %s1332_s25, 11  ;;  %s143_s13 = scalar_lea.vmem [#allocation9], %s869_s8 }
  0x1b   : > { %s1432_s12 = scalar_lea.hbm %s1724_s3, %s903_s9  ;;  %s150_s14 = sshll.u32 %s143_s13, 4  ;;  %s1434_s14 = int_to_ptr.vmem [resolvable:$true] %s150_s14 }
  0x1c   : > { %p1436_p13 = pnand %p986_p11, %p61_p9  ;;  %s1441_s16 = scalar_lea.sflag [#allocation10], %s139_s7 }
  0x1d   : > { %s1058_s17 = scalar_lea.hbm %s1432_s12, 2048  ;;  %s1063_s20 = scalar_lea.hbm %s1724_s3, 4096 }
  0x1e   : > { %p1059_p1 = scmp.ne.s32.totalorder %s1432_s12, %s1058_s17  ;;  %p1060_p2 = pneg %p1436_p13 }
  0x1f   : > { %p1064_p5 = scmp.lt.u32.totalorder %s1432_s12, %s1724_s3  ;;  %p1065_p6 = scmp.lt.u32.totalorder %s1063_s20, %s1058_s17 }
  0x20   : > { %p1061_p3 = pnand %p1060_p2, %p1059_p1  ;;  %p1067_p8 = scmp.lt.u32.totalorder %s1058_s17, %s1432_s12 }
  0x21   : > { %p1066_p7 = por %p1065_p6, %p1064_p5 }
  0x22   : > { %p1062_p4 = pneg %p1061_p3 }
  0x23   : > { %p1068_p9 = por %p1067_p8, %p1066_p7 }
  0x25   : > { %p1069_p10 = pnand %p1068_p9, %p1062_p4 }
  0x27   : > { %1072 = shalt.err (!%p1069_p10)
}
  0x28   : > { %s1073_s23 = scalar_lea.vmem %s1434_s14, 2048  ;;  %s1335_s28 = smov [#allocation9]  }
  0x29   : > { %p1074_p11 = scmp.ne.s32.totalorder %s1434_s14, %s1073_s23  ;;  %s1078_s29 = sshll.u32 %s1335_s28, 4  ;;  %s1079_s29 = int_to_ptr.vmem [resolvable:$false] %s1078_s29 }
  0x2a   : > { %s1080_s7 = scalar_lea.vmem %s1079_s29, 4096  ;;  %p1081_p0 = scmp.lt.s32.totalorder %s1434_s14, %s1079_s29 }
  0x2b   : > { %p1076_p1 = pnand %p1074_p11, %p1060_p2  ;;  %p1082_p5 = scmp.lt.s32.totalorder %s1080_s7, %s1073_s23 }
  0x2d   : > { %p1077_p3 = pneg %p1076_p1  ;;  %p1083_p6 = por %p1082_p5, %p1081_p0 }
  0x2f   : > { %p1084_p7 = pnand %p1083_p6, %p1077_p3 }
  0x31   : > { %1087 = shalt.err (!%p1084_p7)
}
  0x32   : > { %s1336_s8 = smov 128   ;;  %s1337_s9 = smov 8  }
  0x33   : > { %985 = dma.hbm_to_vmem [thread:$0]  (!%p1436_p13), %s1432_s12, 2048, %s1434_s14, %s1441_s16, %s1336_s8, %s1336_s8, %s1337_s9  }
  0x34   : > { %p164_p2 = scmp.lt.s32.totalorder %s1332_s25, 3  ;;  %p1729_p4 = scmp.ge.s32.totalorder %s1332_s25, 1 }
  0x36   : > { %p165_p8 = pnand %p1729_p4, %p164_p2 }
  0x37   : > { %s170_s10 = sand.u32 (!%p165_p8), 1, %s1324_s24  }
  0x38   : > { %168 = sbr.rel (%p165_p8) target bundleno = 1140 (0x474), region = 32  ;;  %s873_s11 = sshll.u32 (!%p165_p8), %s170_s10, 7 }
  0x39   : > { %s171_s13 = scalar_lea.sflag (!%p165_p8), [#allocation10], %s170_s10  ;;  %s1473_s17 = scalar_lea.vmem (!%p165_p8), [#allocation9], %s873_s11 }
  0x3f   : > { %1299 = dma.done.wait (%p1423_p12), %s171_s13, 2048  }
  0x40   : > { %1301 = vsyncadd (%p1423_p12), %s171_s13, 4294965248  ;;  %p196_p0 = scmp.lt.s32.totalorder %s1406_s26, 1  ;;  %p874_p13 = scmp.ne.s32.totalorder %s1406_s26, 0 }
  0x41   : > { %s203_s16 = sld [smem:[#allocation8]] (!%p874_p13)  ;;  %s1338_s18 = smov (!%p874_p13), [#allocation2]  }
  0x42   : > { %s1481_s12 = scalar_select %p196_p0, %s1406_s26, 1 }
  0x43   : > { %202 = sbr.rel (%p874_p13) target bundleno = 260 (0x104), region = 40  ;;  %s213_s19 = sshll.u32 (!%p874_p13), %s1338_s18, 4  ;;  %s1490_s19 = int_to_ptr.vmem [resolvable:$true] %s213_s19 }
  0x44   : > { %s1488_s20 = sld [smem:[#allocation8 + $0x1]] (!%p874_p13)  ;;  %s1339_s6 = smov (!%p874_p13), [#allocation2 + $0x1]  }
  0x45   : > { %s229_s21 = sshll.u32 (!%p874_p13), %s1339_s6, 4  ;;  %s1492_s22 = sld [smem:[#allocation8 + $0x2]] (!%p874_p13)  ;;  %s1494_s21 = int_to_ptr.vmem [resolvable:$true] %s229_s21 }
  0x46   : > { %s1340_s23 = smov (!%p874_p13), [#allocation2 + $0x2]   ;;  %s1496_s29 = sld [smem:[#allocation8 + $0x3]] (!%p874_p13) }
  0x47   : > { %s245_s28 = sshll.u32 (!%p874_p13), %s1340_s23, 4  ;;  %s875_s7 = sshll.u32 (!%p874_p13), %s203_s16, 4  ;;  %s1498_s28 = int_to_ptr.vmem [resolvable:$true] %s245_s28 }
  0x48   : > { %s205_s10 = scalar_lea.hbm (!%p874_p13), %s1723_s2, %s875_s7  ;;  %s1507_s18 = scalar_lea.hbm (!%p874_p13), %s1723_s2, 4096 }
  0x49   : > { %s1088_s13 = scalar_lea.hbm (!%p874_p13), %s205_s10, 16  ;;  %p1091_p9 = scmp.lt.u32.totalorder (!%p874_p13), %s205_s10, %s1723_s2 }
  0x4a   : > { %s877_s11 = sshll.u32 %s1488_s20, 4  ;;  %p1089_p12 = scmp.ne.s32.totalorder %s205_s10, %s1088_s13 }
  0x4b   : > { %p1092_p10 = scmp.lt.u32.totalorder %s1507_s18, %s1088_s13  ;;  %p1094_p1 = scmp.lt.u32.totalorder %s1088_s13, %s205_s10 }
  0x4d   : > { %p1093_p11 = por %p1092_p10, %p1091_p9 }
  0x4f   : > { %p1095_p3 = por %p1094_p1, %p1093_p11 }
  0x51   : > { %p1096_p5 = pnand %p1095_p3, %p1089_p12 }
  0x53   : > { %1099 = shalt.err (!%p1096_p5)  }
  0x54   : > { %s1100_s16 = scalar_lea.vmem %s1490_s19, 16  ;;  %s1516_s20 = scalar_lea.vmem %s1490_s19, 128 }
  0x55   : > { %p1101_p6 = scmp.ne.s32.totalorder %s1490_s19, %s1100_s16  ;;  %p1105_p7 = scmp.lt.s32.totalorder %s1490_s19, %s1490_s19 }
  0x56   : > { %p1106_p2 = scmp.lt.s32.totalorder %s1516_s20, %s1100_s16 }
  0x58   : > { %p1107_p4 = por %p1106_p2, %p1105_p7 }
  0x5a   : > { %p1108_p8 = pnand %p1107_p4, %p1101_p6 }
  0x5c   : > { %1111 = shalt.err (!%p1108_p8)  }
  0x5d   : > { %216 = dma.hbm_to_vmem [thread:$0]  %s205_s10, 16, %s1490_s19, [#allocation3] }
  0x5e   : > { %s219_s7 = scalar_lea.hbm %s1723_s2, %s877_s11  ;;  %s879_s8 = sshll.u32 %s1492_s22, 4 }
  0x5f   : > { %s1112_s9 = scalar_lea.hbm %s219_s7, 16  ;;  %p1115_p13 = scmp.lt.u32.totalorder %s219_s7, %s1723_s2 }
  0x60   : > { %p1113_p0 = scmp.ne.s32.totalorder %s219_s7, %s1112_s9  ;;  %p1116_p12 = scmp.lt.u32.totalorder %s1507_s18, %s1112_s9 }
  0x61   : > { %p1118_p10 = scmp.lt.u32.totalorder %s1112_s9, %s219_s7 }
  0x62   : > { %p1117_p9 = por %p1116_p12, %p1115_p13 }
  0x64   : > { %p1119_p11 = por %p1118_p10, %p1117_p9 }
  0x66   : > { %p1120_p1 = pnand %p1119_p11, %p1113_p0 }
  0x68   : > { %1123 = shalt.err (!%p1120_p1)  }
  0x69   : > { %s1124_s10 = scalar_lea.vmem %s1494_s21, 16  ;;  %p1129_p5 = scmp.lt.s32.totalorder %s1494_s21, %s1490_s19 }
  0x6a   : > { %p1125_p3 = scmp.ne.s32.totalorder %s1494_s21, %s1124_s10  ;;  %p1130_p6 = scmp.lt.s32.totalorder %s1516_s20, %s1124_s10 }
  0x6c   : > { %p1131_p7 = por %p1130_p6, %p1129_p5 }
  0x6e   : > { %p1132_p2 = pnand %p1131_p7, %p1125_p3 }
  0x70   : > { %1135 = shalt.err (!%p1132_p2)  }
  0x71   : > { %232 = dma.hbm_to_vmem [thread:$0]  %s219_s7, 16, %s1494_s21, [#allocation3 + $0x1] }
  0x72   : > { %s235_s14 = scalar_lea.hbm %s1723_s2, %s879_s8  ;;  %s881_s6 = sshll.u32 %s1496_s29, 4 }
  0x73   : > { %s1136_s16 = scalar_lea.hbm %s235_s14, 16  ;;  %p1139_p8 = scmp.lt.u32.totalorder %s235_s14, %s1723_s2 }
  0x74   : > { %p1137_p4 = scmp.ne.s32.totalorder %s235_s14, %s1136_s16  ;;  %p1140_p0 = scmp.lt.u32.totalorder %s1507_s18, %s1136_s16 }
  0x75   : > { %p1142_p12 = scmp.lt.u32.totalorder %s1136_s16, %s235_s14 }
  0x76   : > { %p1141_p13 = por %p1140_p0, %p1139_p8 }
  0x78   : > { %p1143_p9 = por %p1142_p12, %p1141_p13 }
  0x7a   : > { %p1144_p10 = pnand %p1143_p9, %p1137_p4 }
  0x7c   : > { %1147 = shalt.err (!%p1144_p10)  }
  0x7d   : > { %s1148_s21 = scalar_lea.vmem %s1498_s28, 16  ;;  %p1153_p1 = scmp.lt.s32.totalorder %s1498_s28, %s1490_s19 }
  0x7e   : > { %p1149_p11 = scmp.ne.s32.totalorder %s1498_s28, %s1148_s21  ;;  %p1154_p3 = scmp.lt.s32.totalorder %s1516_s20, %s1148_s21 }
  0x80   : > { %p1155_p5 = por %p1154_p3, %p1153_p1 }
  0x82   : > { %p1156_p6 = pnand %p1155_p5, %p1149_p11 }
  0x84   : > { %1159 = shalt.err (!%p1156_p6)  }
  0x85   : > { %248 = dma.hbm_to_vmem [thread:$0]  %s235_s14, 16, %s1498_s28, [#allocation3 + $0x2] }
  0x86   : > { %s251_s8 = scalar_lea.hbm %s1723_s2, %s881_s6  ;;  %s1341_s9 = smov [#allocation2 + $0x3]  }
  0x87   : > { %s261_s13 = sshll.u32 %s1341_s9, 4  ;;  %s1553_s25 = sld [smem:[#allocation8 + $0x4]]  ;;  %s262_s13 = int_to_ptr.vmem [resolvable:$true] %s261_s13 }
  0x88   : > { %s1160_s10 = scalar_lea.hbm %s251_s8, 16  ;;  %p1163_p2 = scmp.lt.u32.totalorder %s251_s8, %s1723_s2 }
  0x89   : > { %p1161_p7 = scmp.ne.s32.totalorder %s251_s8, %s1160_s10  ;;  %p1164_p4 = scmp.lt.u32.totalorder %s1507_s18, %s1160_s10 }
  0x8a   : > { %p1166_p0 = scmp.lt.u32.totalorder %s1160_s10, %s251_s8 }
  0x8b   : > { %p1165_p8 = por %p1164_p4, %p1163_p2 }
  0x8d   : > { %p1167_p13 = por %p1166_p0, %p1165_p8 }
  0x8f   : > { %p1168_p12 = pnand %p1167_p13, %p1161_p7 }
  0x91   : > { %1171 = shalt.err (!%p1168_p12)  }
  0x92   : > { %s1172_s28 = scalar_lea.vmem %s262_s13, 16  ;;  %p1177_p10 = scmp.lt.s32.totalorder %s262_s13, %s1490_s19 }
  0x93   : > { %p1173_p9 = scmp.ne.s32.totalorder %s262_s13, %s1172_s28  ;;  %p1178_p11 = scmp.lt.s32.totalorder %s1516_s20, %s1172_s28 }
  0x95   : > { %p1179_p1 = por %p1178_p11, %p1177_p10 }
  0x97   : > { %p1180_p3 = pnand %p1179_p1, %p1173_p9 }
  0x99   : > { %1183 = shalt.err (!%p1180_p3)  }
  0x9a   : > { %264 = dma.hbm_to_vmem [thread:$0]  %s251_s8, 16, %s262_s13, [#allocation3 + $0x3] }
  0x9b   : > { %s1342_s14 = smov [#allocation2 + $0x4]   ;;  %s1561_s16 = sld [smem:[#allocation8 + $0x5]] }
  0x9c   : > { %s277_s6 = sshll.u32 %s1342_s14, 4  ;;  %s1343_s15 = smov [#allocation2 + $0x5]   ;;  %s278_s6 = int_to_ptr.vmem [resolvable:$true] %s277_s6 }
  0x9d   : > { %s293_s23 = sshll.u32 %s1343_s15, 4  ;;  %s1563_s21 = sld [smem:[#allocation8 + $0x6]]  ;;  %s1566_s23 = int_to_ptr.vmem [resolvable:$true] %s293_s23 }
  0x9e   : > { %s883_s29 = sshll.u32 %s1553_s25, 4 }
  0x9f   : > { %s267_s10 = scalar_lea.hbm %s1723_s2, %s883_s29 }
  0xa0   : > { %s1184_s22 = scalar_lea.hbm %s267_s10, 16  ;;  %p1187_p6 = scmp.lt.u32.totalorder %s267_s10, %s1723_s2 }
  0xa1   : > { %p1185_p5 = scmp.ne.s32.totalorder %s267_s10, %s1184_s22  ;;  %p1188_p7 = scmp.lt.u32.totalorder %s1507_s18, %s1184_s22 }
  0xa2   : > { %p1190_p4 = scmp.lt.u32.totalorder %s1184_s22, %s267_s10 }
  0xa3   : > { %p1189_p2 = por %p1188_p7, %p1187_p6 }
  0xa5   : > { %p1191_p8 = por %p1190_p4, %p1189_p2 }
  0xa7   : > { %p1192_p0 = pnand %p1191_p8, %p1185_p5 }
  0xa9   : > { %1195 = shalt.err (!%p1192_p0)  }
  0xaa   : > { %s1196_s11 = scalar_lea.vmem %s278_s6, 16  ;;  %p1201_p12 = scmp.lt.s32.totalorder %s278_s6, %s1490_s19 }
  0xab   : > { %p1197_p13 = scmp.ne.s32.totalorder %s278_s6, %s1196_s11  ;;  %p1202_p9 = scmp.lt.s32.totalorder %s1516_s20, %s1196_s11 }
  0xad   : > { %p1203_p10 = por %p1202_p9, %p1201_p12 }
  0xaf   : > { %p1204_p11 = pnand %p1203_p10, %p1197_p13 }
  0xb1   : > { %1207 = shalt.err (!%p1204_p11)  }
  0xb2   : > { %280 = dma.hbm_to_vmem [thread:$0]  %s267_s10, 16, %s278_s6, [#allocation3 + $0x4] }
  0xb3   : > { %s885_s25 = sshll.u32 %s1561_s16, 4  ;;  %s1344_s28 = smov [#allocation2 + $0x6]  }
  0xb4   : > { %s309_s14 = sshll.u32 %s1344_s28, 4  ;;  %s283_s7 = scalar_lea.hbm %s1723_s2, %s885_s25  ;;  %s1581_s14 = int_to_ptr.vmem [resolvable:$true] %s309_s14 }
  0xb5   : > { %s1208_s9 = scalar_lea.hbm %s283_s7, 16  ;;  %p1211_p3 = scmp.lt.u32.totalorder %s283_s7, %s1723_s2 }
  0xb6   : > { %p1209_p1 = scmp.ne.s32.totalorder %s283_s7, %s1208_s9  ;;  %p1212_p5 = scmp.lt.u32.totalorder %s1507_s18, %s1208_s9 }
  0xb7   : > { %p1214_p7 = scmp.lt.u32.totalorder %s1208_s9, %s283_s7 }
  0xb8   : > { %p1213_p6 = por %p1212_p5, %p1211_p3 }
  0xba   : > { %p1215_p2 = por %p1214_p7, %p1213_p6 }
  0xbc   : > { %p1216_p4 = pnand %p1215_p2, %p1209_p1 }
  0xbe   : > { %1219 = shalt.err (!%p1216_p4)  }
  0xbf   : > { %s1220_s6 = scalar_lea.vmem %s1566_s23, 16  ;;  %p1225_p0 = scmp.lt.s32.totalorder %s1566_s23, %s1490_s19 }
  0xc0   : > { %p1221_p8 = scmp.ne.s32.totalorder %s1566_s23, %s1220_s6  ;;  %p1226_p13 = scmp.lt.s32.totalorder %s1516_s20, %s1220_s6 }
  0xc2   : > { %p1227_p12 = por %p1226_p13, %p1225_p0 }
  0xc4   : > { %p1228_p9 = pnand %p1227_p12, %p1221_p8 }
  0xc6   : > { %1231 = shalt.err (!%p1228_p9)  }
  0xc7   : > { %296 = dma.hbm_to_vmem [thread:$0]  %s283_s7, 16, %s1566_s23, [#allocation3 + $0x5] }
  0xc8   : > { %s887_s16 = sshll.u32 %s1563_s21, 4  ;;  %s888_s10 = sld [smem:[#allocation8 + $0x7]] }
  0xc9   : > { %s299_s25 = scalar_lea.hbm %s1723_s2, %s887_s16 }
  0xca   : > { %s1232_s28 = scalar_lea.hbm %s299_s25, 16  ;;  %p1235_p11 = scmp.lt.u32.totalorder %s299_s25, %s1723_s2 }
  0xcb   : > { %p1233_p10 = scmp.ne.s32.totalorder %s299_s25, %s1232_s28  ;;  %p1236_p1 = scmp.lt.u32.totalorder %s1507_s18, %s1232_s28 }
  0xcc   : > { %p1238_p5 = scmp.lt.u32.totalorder %s1232_s28, %s299_s25 }
  0xcd   : > { %p1237_p3 = por %p1236_p1, %p1235_p11 }
  0xcf   : > { %p1239_p6 = por %p1238_p5, %p1237_p3 }
  0xd1   : > { %p1240_p7 = pnand %p1239_p6, %p1233_p10 }
  0xd3   : > { %1243 = shalt.err (!%p1240_p7)  }
  0xd4   : > { %s1244_s23 = scalar_lea.vmem %s1581_s14, 16  ;;  %p1249_p4 = scmp.lt.s32.totalorder %s1581_s14, %s1490_s19 }
  0xd5   : > { %p1245_p2 = scmp.ne.s32.totalorder %s1581_s14, %s1244_s23  ;;  %p1250_p8 = scmp.lt.s32.totalorder %s1516_s20, %s1244_s23 }
  0xd7   : > { %p1251_p0 = por %p1250_p8, %p1249_p4 }
  0xd9   : > { %p1252_p13 = pnand %p1251_p0, %p1245_p2 }
  0xdb   : > { %1255 = shalt.err (!%p1252_p13)  }
  0xdc   : > { %312 = dma.hbm_to_vmem [thread:$0]  %s299_s25, 16, %s1581_s14, [#allocation3 + $0x6] }
  0xdd   : > { %s1345_s21 = smov [#allocation2 + $0x7]   ;;  %s889_s9 = sshll.u32 %s888_s10, 4 }
  0xde   : > { %s325_s7 = sshll.u32 %s1345_s21, 4  ;;  %s315_s6 = scalar_lea.hbm %s1723_s2, %s889_s9  ;;  %s326_s7 = int_to_ptr.vmem [resolvable:$true] %s325_s7 }
  0xdf   : > { %s1256_s16 = scalar_lea.hbm %s315_s6, 16  ;;  %p1259_p9 = scmp.lt.u32.totalorder %s315_s6, %s1723_s2 }
  0xe0   : > { %p1257_p12 = scmp.ne.s32.totalorder %s315_s6, %s1256_s16  ;;  %p1260_p10 = scmp.lt.u32.totalorder %s1507_s18, %s1256_s16 }
  0xe1   : > { %p1262_p1 = scmp.lt.u32.totalorder %s1256_s16, %s315_s6 }
  0xe2   : > { %p1261_p11 = por %p1260_p10, %p1259_p9 }
  0xe4   : > { %p1263_p3 = por %p1262_p1, %p1261_p11 }
  0xe6   : > { %p1264_p5 = pnand %p1263_p3, %p1257_p12 }
  0xe8   : > { %1267 = shalt.err (!%p1264_p5)  }
  0xe9   : > { %s1268_s14 = scalar_lea.vmem %s326_s7, 16  ;;  %p1273_p7 = scmp.lt.s32.totalorder %s326_s7, %s1490_s19 }
  0xea   : > { %p1269_p6 = scmp.ne.s32.totalorder %s326_s7, %s1268_s14  ;;  %p1274_p2 = scmp.lt.s32.totalorder %s1516_s20, %s1268_s14 }
  0xec   : > { %p1275_p4 = por %p1274_p2, %p1273_p7 }
  0xee   : > { %p1276_p8 = pnand %p1275_p4, %p1269_p6 }
  0xf0   : > { %1279 = shalt.err (!%p1276_p8)  }
  0xf1   : > { %328 = dma.hbm_to_vmem [thread:$0]  %s315_s6, 16, %s326_s7, [#allocation3 + $0x7] }
  0xf2   : > { %1302 = dma.done.wait [#allocation3], 16 }
  0xf3   : > { %1303 = vsyncadd [#allocation3], 4294967280 }
  0xf4   : > { %1304 = dma.done.wait [#allocation3 + $0x1], 16 }
  0xf5   : > { %1305 = vsyncadd [#allocation3 + $0x1], 4294967280 }
  0xf6   : > { %1306 = dma.done.wait [#allocation3 + $0x2], 16 }
  0xf7   : > { %1307 = vsyncadd [#allocation3 + $0x2], 4294967280 }
  0xf8   : > { %1308 = dma.done.wait [#allocation3 + $0x3], 16 }
  0xf9   : > { %1309 = vsyncadd [#allocation3 + $0x3], 4294967280 }
  0xfa   : > { %1310 = dma.done.wait [#allocation3 + $0x4], 16 }
  0xfb   : > { %1311 = vsyncadd [#allocation3 + $0x4], 4294967280 }
  0xfc   : > { %1312 = dma.done.wait [#allocation3 + $0x5], 16 }
  0xfd   : > { %1313 = vsyncadd [#allocation3 + $0x5], 4294967280 }
  0xfe   : > { %1314 = dma.done.wait [#allocation3 + $0x6], 16 }
  0xff   : > { %1315 = vsyncadd [#allocation3 + $0x6], 4294967280 }
 0x100   : > { %1316 = dma.done.wait [#allocation3 + $0x7], 16 }
 0x101   : > { %1317 = vsyncadd [#allocation3 + $0x7], 4294967280  ;;  %vm346_vm0 = vcmask 7168   ;;  %vm349_vm1 = vcmask 31744   ;;  %v1346_v0 = vmov -inf   ;;  %v1347_v1 = vmov 0.0  }
 0x102   : > { %347 = vst.msk [vmem:[#allocation4] sm:$0xff] %vm346_vm0, %v1346_v0  ;;  %348 = vst.msk [vmem:[#allocation5] sm:$0xff] %vm346_vm0, %v1347_v1 }
 0x103   : > { %350 = vst.msk [vmem:[#allocation6] sm:$0xff] %vm349_vm1, %v1347_v1 }
 0x104 PF: > { %v352_v2 = vld [vmem:[%s1473_s17] sm:$0xff]  ;;  %v353_v3 = vld [vmem:[%s1473_s17 + $0x8] sm:$0xff]  ;;  %v472_v4 = vlaneseq  ;;  %v1348_v5 = vmov 0.0|0.0   ;;  %vm1349_vm2 = vmmov 0   ;;  %v1350_v7 = vmov 0.0   ;;  %s891_s19 = sshll.u32 %s1406_s26, 7  ;;  %s1730_s28 = scalar_lea.vmem %s1725_s4, %s1481_s12 }
 0x105   : > { %956 = vmatprep.subr.bf16.mxu0 %v1348_v5  ;;  %v957_v6 = vpack.c.bf16 %v353_v3, %v352_v2  ;;  %953 = vmatprep.mubr.msk.f32.mxu0 %vm1349_vm2, %v1350_v7  ;;  %v470_v9 = vstv %s891_s19  ;;  %v354_v10 = vld [vmem:[%s1473_s17 + $0x10] sm:$0xff]  ;;  %v355_v11 = vld [vmem:[%s1473_s17 + $0x18] sm:$0xff]  ;;  %v469_v13 = vld [vmem:[%s1722_s1] sm:$0xff]  ;;  %v1351_v54 = vmov 1966171168   ;;  %vm636_vm4 = vcmask 1043456  }
 0x106   : > { %v1621_v8 = vshrl.u32 %v472_v4, 7  ;;  %v471_v14 = vsub.s32 %v469_v13, %v470_v9  ;;  %v960_v16 = vpack.c.bf16 %v355_v11, %v354_v10  ;;  %v356_v20 = vld [vmem:[%s1473_s17 + $0x20] sm:$0xff]  ;;  %v357_v21 = vld [vmem:[%s1473_s17 + $0x28] sm:$0xff]  ;;  %v358_v27 = vld [vmem:[%s1473_s17 + $0x30] sm:$0xff]  ;;  %v541_v55 = vunpack.c.l.s4 %v1351_v54  ;;  %p892_p0 = scmp.ne.s32.totalorder %s1406_s26, 1 }
 0x107   : > { %958 = vmatpush3.bf16.xpose.msra.mxu0 %v957_v6  ;;  %v963_v24 = vpack.c.bf16 %v357_v21, %v356_v20  ;;  %v359_v28 = vld [vmem:[%s1473_s17 + $0x38] sm:$0xff]  ;;  %v360_v34 = vld [vmem:[%s1473_s17 + $0x40] sm:$0xff]  ;;  %v361_v35 = vld [vmem:[%s1473_s17 + $0x48] sm:$0xff]  ;;  %v1667_v0 = vand.u32 127, %v472_v4  ;;  %vm465_vm12 = vcmask 7168   ;;  %vm702_vm13 = vcmask 1041409  }
 0x108   : > { %959 = vmatprep.subr.bf16.mxu0 %v1348_v5  ;;  %v1627_v12 = vsub.s32 0, %v1621_v8  ;;  %v483_v15 = vsub.s32 1, %v1621_v8  ;;  %v490_v19 = vsub.s32 2, %v1621_v8  ;;  %v497_v23 = vsub.s32 3, %v1621_v8  ;;  %v362_v40 = vld [vmem:[%s1473_s17 + $0x50] sm:$0xff]  ;;  %v363_v41 = vld [vmem:[%s1473_s17 + $0x58] sm:$0xff] }
 0x109   : > { %v504_v26 = vsub.s32 4, %v1621_v8  ;;  %v511_v30 = vsub.s32 5, %v1621_v8  ;;  %v966_v31 = vpack.c.bf16 %v359_v28, %v358_v27  ;;  %v518_v33 = vsub.s32 6, %v1621_v8  ;;  %v364_v43 = vld [vmem:[%s1473_s17 + $0x60] sm:$0xff]  ;;  %v365_v44 = vld [vmem:[%s1473_s17 + $0x68] sm:$0xff]  ;;  %v366_v46 = vld [vmem:[%s1473_s17 + $0x70] sm:$0xff] }
 0x10a   : > { %v477_v17 = vrot.slane %v471_v14, %v1627_v12  ;;  %v484_v18 = vrot.slane %v471_v14, %v483_v15  ;;  %v491_v22 = vrot.slane %v471_v14, %v490_v19  ;;  %v498_v25 = vrot.slane %v471_v14, %v497_v23  ;;  %v367_v47 = vld [vmem:[%s1473_s17 + $0x78] sm:$0xff]  ;;  %v351_v49 = vld [vmem:[#allocation2] sm:$0xff] }
 0x10b   : > { %v505_v29 = vrot.slane %v471_v14, %v504_v26  ;;  %v512_v32 = vrot.slane %v471_v14, %v511_v30  ;;  %v519_v36 = vrot.slane %v471_v14, %v518_v33  ;;  %v525_v37 = vsub.s32 7, %v1621_v8  ;;  %v890_v58 = vld [vmem:[%s1730_s28] ss:$0 sm:$0xff] }
 0x10c   : > { %479 = vbcast.lane.b32.xlu1 %v477_v17, 256  ;;  %v969_v38 = vpack.c.bf16 %v361_v35, %v360_v34  ;;  %v972_v42 = vpack.c.bf16 %v363_v41, %v362_v40  ;;  %v975_v45 = vpack.c.bf16 %v365_v44, %v364_v43  ;;  %v978_v48 = vpack.c.bf16 %v367_v47, %v366_v46  ;;  %v445_v43 = vld [vmem:[#allocation4] sm:$0xff] }
 0x10d   : > { %v526_v39 = vrot.slane %v471_v14, %v525_v37  ;;  %v542_v57 = vunpack.c.0.s8 %v541_v55  ;;  %vm704_vm14 = vcmask 1042434   ;;  %vm706_vm15 = vcmask 1043459  }
 0x10e   : > { %vm708_vm0 = vcmask 1044484   ;;  %vm710_vm1 = vcmask 1045509   ;;  %vm712_vm2 = vcmask 1046534  }
 0x10f   : > { %961 = vmatpush3.bf16.xpose.msra.mxu0 %v960_v16  ;;  %v545_v60 = vsub.s32 %v542_v57, %v1621_v8 }
 0x110   : > { %962 = vmatprep.subr.bf16.mxu0 %v1348_v5  ;;  %486 = vbcast.lane.b32.xlu1 %v484_v18, 256 }
 0x114   : > { %493 = vbcast.lane.b32.xlu1 %v491_v22, 256 }
 0x117   : > { %964 = vmatpush3.bf16.xpose.msra.mxu0 %v963_v24 }
 0x118   : > { %965 = vmatprep.subr.bf16.mxu0 %v1348_v5  ;;  %500 = vbcast.lane.b32.xlu1 %v498_v25, 256 }
 0x11c   : > { %507 = vbcast.lane.b32.xlu1 %v505_v29, 256 }
 0x11f   : > { %967 = vmatpush3.bf16.xpose.msra.mxu0 %v966_v31 }
 0x120   : > { %968 = vmatprep.subr.bf16.mxu0 %v1348_v5  ;;  %514 = vbcast.lane.b32.xlu1 %v512_v32, 256 }
 0x124   : > { %521 = vbcast.lane.b32.xlu1 %v519_v36, 256 }
 0x127   : > { %970 = vmatpush3.bf16.xpose.msra.mxu0 %v969_v38 }
 0x128   : > { %971 = vmatprep.subr.bf16.mxu0 %v1348_v5  ;;  %528 = vbcast.lane.b32.xlu1 %v526_v39, 256  ;;  %v1352_v39 = vmov 0  }
 0x129   : > { %1038 = vset.pattern.permute.xlu0 %v1352_v39 }
 0x12f   : > { %973 = vmatpush3.bf16.xpose.msra.mxu0 %v972_v42 }
 0x130   : > { %974 = vmatprep.subr.bf16.mxu0 %v1348_v5 }
 0x137   : > { %976 = vmatpush3.bf16.xpose.msra.mxu0 %v975_v45 }
 0x138   : > { %977 = vmatprep.subr.bf16.mxu0 %v1348_v5 }
 0x13f   : > { %979 = vmatpush3.bf16.xpose.msra.mxu0 %v978_v48 }
 0x146   : > { %954 = vmatmul.mubr.f32.vlgmr.msra.gmra.mrb[0].mxu0 %v351_v49 }
 0x17e   : > { %v480_v50 = vpop.permute.xlu1 %479 }
 0x17f   : > { %vm530_vm3 = vcmp.eq.s32.totalorder %v1667_v0, %v480_v50 }
 0x182   : > { %v487_v51 = vpop.permute.xlu1 %486 }
 0x183   : > { %vm531_vm6 = vcmp.eq.s32.totalorder %v1667_v0, %v487_v51 }
 0x186   : > { %v494_v52 = vpop.permute.xlu1 %493 }
 0x187   : > { %vm532_vm5 = vcmp.eq.s32.totalorder %v1667_v0, %v494_v52 }
 0x18a   : > { %v501_v53 = vpop.permute.xlu1 %500 }
 0x18b   : > { %vm533_vm7 = vcmp.eq.s32.totalorder %v1667_v0, %v501_v53  ;;  %v672_v53 = vsub.s32 %v1667_v0, %v1621_v8 }
 0x18e   : > { %v508_v56 = vpop.permute.xlu1 %507 }
 0x18f   : > { %vm534_vm10 = vcmp.eq.s32.totalorder %v1667_v0, %v508_v56 }
 0x192   : > { %v515_v59 = vpop.permute.xlu1 %514 }
 0x193   : > { %vm535_vm8 = vcmp.eq.s32.totalorder %v1667_v0, %v515_v59 }
 0x196   : > { %v522_v3 = vpop.permute.xlu1 %521 }
 0x197   : > { %vm536_vm11 = vcmp.eq.s32.totalorder %v1667_v0, %v522_v3 }
 0x19a   : > { %v529_v20 = vpop.permute.xlu1 %528 }
 0x19b   : > { %vm537_vm9 = vcmp.eq.s32.totalorder %v1667_v0, %v529_v20  ;;  %v1353_v20 = vmov (!%p892_p0), 0  }
 0x219   : > { %v441_v61 = vpop.f32.mrb[0].mxu0 }
 0x21a   : > { %v1664_v62 = vadd.f32 %v890_v58, %v441_v61  ;;  %v955_v63 = vpop.f32.mrb[1].mxu0 }
 0x21c   : > { %v539_v1 = vcombine.high %v1664_v62, %v1664_v62  ;;  %446 = vmax.xlane.f32.xlu0 %v1664_v62  ;;  %v546_v2 = vrot.slane %v1664_v62, %v545_v60 }
 0x21e   : > { %v562_v5 = vrot.slane %v546_v2, %v545_v60  ;;  %v554_v6 = vcombine.high %v546_v2, %v546_v2  ;;  %v553_v7 = vrot.slane %v539_v1, %v545_v60 }
 0x220   : > { %v591_v9 = vrot.slane %v562_v5, %v1627_v12  ;;  %v584_v10 = vcombine.high %v562_v5, %v562_v5  ;;  %v576_v11 = vrot.slane %v554_v6, %v545_v60  ;;  %v555_v4 = vcombine.high %v553_v7, %v553_v7 }
 0x221   : > { %v569_v17 = vrot.slane %v553_v7, %v545_v60  ;;  %v661_v7 = vld [vmem:[#allocation6] sm:$0xff] }
 0x222   : > { %v628_v13 = vsel %vm530_vm3, %v591_v9, 0.0  ;;  %v599_v14 = vrot.slane %v584_v10, %v1627_v12  ;;  %v586_v15 = vcombine.high %v576_v11, %v576_v11  ;;  %v595_v18 = vrot.slane %v576_v11, %v1627_v12 }
 0x223   : > { %v637_v16 = vsel %vm636_vm4, %v628_v13, 0.0  ;;  %v583_v19 = vrot.slane %v555_v4, %v545_v60  ;;  %v607_v28 = vrot.slane %v569_v17, %v1627_v12  ;;  %v585_v30 = vcombine.high %v569_v17, %v569_v17 }
 0x224   : > { %638 = vadd.xlane.f32.xlu1 %v637_v16  ;;  %v630_v21 = vsel %vm532_vm5, %v599_v14, 0.0  ;;  %v603_v22 = vrot.slane %v586_v15, %v1627_v12  ;;  %v629_v23 = vsel %vm531_vm6, %v595_v18, 0.0  ;;  %vm714_vm3 = vcmask 1047559   ;;  %v449_v15 = vld [vmem:[#allocation5] sm:$0xff] }
 0x225   : > { %v640_v24 = vsel %vm636_vm4, %v629_v23, 0.0  ;;  %v611_v25 = vrot.slane %v583_v19, %v1627_v12  ;;  %v587_v26 = vcombine.high %v583_v19, %v583_v19  ;;  %v643_v27 = vsel %vm636_vm4, %v630_v21, 0.0 }
 0x226   : > { %v631_v29 = vsel %vm533_vm7, %v603_v22, 0.0  ;;  %v632_v37 = vsel %vm534_vm10, %v607_v28, 0.0  ;;  %v615_v38 = vrot.slane %v585_v30, %v1627_v12  ;;  %vm745_vm5 = vcmask (!%p892_p0), 24576  }
 0x227   : > { %v633_v31 = vsel %vm535_vm8, %v611_v25, 0.0  ;;  %v619_v32 = vrot.slane %v587_v26, %v1627_v12  ;;  %v646_v35 = vsel %vm636_vm4, %v631_v29, 0.0  ;;  %v649_v40 = vsel %vm636_vm4, %v632_v37, 0.0 }
 0x228   : > { %644 = vadd.xlane.f32.xlu1 %v643_v27  ;;  %v652_v33 = vsel %vm636_vm4, %v633_v31, 0.0  ;;  %v634_v41 = vsel %vm536_vm11, %v615_v38, 0.0 }
 0x229   : > { %v635_v34 = vsel %vm537_vm9, %v619_v32, 0.0  ;;  %v655_v42 = vsel %vm636_vm4, %v634_v41, 0.0 }
 0x22a   : > { %v658_v36 = vsel %vm636_vm4, %v635_v34, 0.0  ;;  %vm718_vm4 = vcmask 31744  }
 0x22c   : > { %647 = vadd.xlane.f32.xlu1 %v646_v35 }
 0x230   : > { %650 = vadd.xlane.f32.xlu1 %v649_v40 }
 0x234   : > { %656 = vadd.xlane.f32.xlu1 %v655_v42 }
 0x2a9   : > { %v447_v44 = vpop.xlane.xlu0 %446 }
 0x2aa   : > { %v448_v45 = vmax.f32 %v445_v43, %v447_v44 }
 0x2ac   : > { %v450_v46 = vsub.f32 %v445_v43, %v448_v45  ;;  %467 = vst.msk [vmem:[#allocation4] sm:$0xff] %vm465_vm12, %v448_v45  ;;  %456 = vperm.xlu0 %1038, %v448_v45  }
 0x2ae   : > { %v451_v13 = vmul.f32 1.442695, %v450_v46 }
 0x2b0   : > { %1043 = vset.pattern.permute.xlu0 (!%p892_p0), %v1353_v20 }
 0x2b1   : > { %v639_v50 = vpop.xlane.xlu1 %638 }
 0x2b2   : > { %v673_v56 = vrot.slane %v639_v50, %v672_v53 }
 0x2b3   : > { %v724_v22 = vld [vmem:[#allocation4] sm:$0xff] (!%p892_p0) }
 0x2b5   : > { %v645_v51 = vpop.xlane.xlu1 %644 }
 0x2b6   : > { %v681_v58 = vrot.slane %v645_v51, %v672_v53 }
 0x2b9   : > { %v648_v52 = vpop.xlane.xlu1 %647 }
 0x2ba   : > { %v685_v59 = vrot.slane %v648_v52, %v672_v53 }
 0x2bd   : > { %v651_v54 = vpop.xlane.xlu1 %650 }
 0x2be   : > { %v689_v61 = vrot.slane %v651_v54, %v672_v53 }
 0x2c1   : > { %v657_v1 = vpop.xlane.xlu1 %656 }
 0x2c2   : > { %v697_v0 = vrot.slane %v657_v1, %v672_v53 }
 0x2cb   : > { %641 = vadd.xlane.f32.xlu0 %v640_v24 }
 0x2cf   : > { %653 = vadd.xlane.f32.xlu0 %v652_v33 }
 0x2d3   : > { %659 = vadd.xlane.f32.xlu0 %v658_v36 }
 0x32b   : > { %v457_v12 = vpop.permute.xlu0 %456 }
 0x32c   : > { %v459_v47 = vsub.f32 %v1664_v62, %v457_v12 }
 0x32e   : > { %v460_v48 = vmul.f32 1.442695, %v459_v47 }
 0x330   : > { %1039 = vpow2.f32 %v460_v48 }
 0x331   : > { %1041 = vpow2.f32 %v451_v13 }
 0x33a   : > { %v1040_v49 = vpop.eup %1039 }
 0x33b   : > { %462 = vadd.xlane.f32.xlu1 %v1040_v49  ;;  %v1042_v14 = vpop.eup %1041 }
 0x33c   : > { %v453_v16 = vmul.f32 %v1042_v14, %v449_v15 }
 0x358   : > { %v642_v55 = vpop.xlane.xlu0 %641 }
 0x359   : > { %v677_v57 = vrot.slane %v642_v55, %v672_v53 }
 0x35b   : > { %v703_v60 = vsel %vm702_vm13, %v677_v57, %v673_v56 }
 0x35c   : > { %v705_v62 = vsel %vm704_vm14, %v681_v58, %v703_v60  ;;  %v654_v63 = vpop.xlane.xlu0 %653 }
 0x35d   : > { %v707_v2 = vsel %vm706_vm15, %v685_v59, %v705_v62  ;;  %v693_v3 = vrot.slane %v654_v63, %v672_v53 }
 0x35e   : > { %v709_v5 = vsel %vm708_vm0, %v689_v61, %v707_v2 }
 0x35f   : > { %v711_v8 = vsel %vm710_vm1, %v693_v3, %v709_v5 }
 0x360   : > { %v660_v6 = vpop.xlane.xlu0 %659  ;;  %v713_v10 = vsel %vm712_vm2, %v697_v0, %v711_v8 }
 0x361   : > { %v701_v9 = vrot.slane %v660_v6, %v672_v53 }
 0x363   : > { %v715_v11 = vsel %vm714_vm3, %v701_v9, %v713_v10 }
 0x364   : > { %v717_v4 = vadd.f32 %v715_v11, %v661_v7 }
 0x366   : > { %719 = vst.msk [vmem:[#allocation6] sm:$0xff] %vm718_vm4, %v717_v4 }
 0x36d   : > { %v729_v25 = vld [vmem:[#allocation6] sm:$0xff] (!%p892_p0) }
 0x3c5   : > { %723 = sbr.rel (%p892_p0) target bundleno = 1140 (0x474), region = 76 }
 0x3c8   : > { %v463_v17 = vpop.xlane.xlu1 %462 }
 0x3c9   : > { %v464_v18 = vadd.f32 %v463_v17, %v453_v16 }
 0x3cb   : > { %466 = vst.msk [vmem:[#allocation5] sm:$0xff] %vm465_vm12, %v464_v18 }
 0x3d2   : > { %v725_v19 = vld [vmem:[#allocation5] sm:$0xff] }
 0x3d3   : > { %1044 = vlog2.f32 %v725_v19 }
 0x3dd   : > { %v1045_v21 = vpop.eup %1044 }
 0x3de   : > { %v727_v23 = vmul.f32 0.6931472, %v1045_v21 }
 0x3e0   : > { %v728_v24 = vadd.f32 %v727_v23, %v724_v22 }
 0x3e2   : > { %732 = vperm.xlu0 %1043, %v728_v24  }
 0x461   : > { %v733_v26 = vpop.permute.xlu0 %732 }
 0x462   : > { %v735_v27 = vsub.f32 %v733_v26, %v729_v25 }
 0x464   : > { %v736_v28 = vsel %vm718_vm4, %v735_v27, 0.0 }
 0x465   : > { %v737_v29 = vrot.slane %v736_v28, 4 }
 0x467   : > { %v738_v30 = vadd.f32 %v737_v29, %v736_v28 }
 0x469   : > { %v739_v31 = vrot.slane %v738_v30, 2 }
 0x46b   : > { %v740_v32 = vadd.f32 %v739_v31, %v738_v30 }
 0x46d   : > { %v741_v33 = vrot.slane %v740_v32, 1 }
 0x46f   : > { %v742_v34 = vadd.f32 %v741_v33, %v740_v32 }
 0x471   : > { %v744_v35 = vmul.f32 0.125, %v742_v34 }
 0x473   : > { %746 = vst.msk [vmem:[%s1726_s5] sm:$0x1] %vm745_vm5, %v744_v35 }
 0x474 PF: > { %p21_p13 = scmp.ge.s32.totalorder %s1409_s27, 4   ;;  %s1731_s23 = smov %s1324_s24 }
 0x475   : > { %s1732_s24 = smov %s1328_s0  ;;  %s1733_s0 = smov %s1419_s30 }
 0x476   : > { %s1734_s25 = smov %s1409_s27  ;;  %23 = sbr.rel (!%p21_p13) target bundleno = 18 (0x12), region = 140 }
 0x47d   :  { %758 = vsyncpa [#allocation10], 1 }
 0x47e   :  { %760 = vsyncpa [#allocation10 + $0x1], 1 }
 0x47f   :  { %761 = vsyncmov [#allocation3] }
 0x482   :  { %s762_s12 = vpop.sfrf %761 }
 0x483   :  { %p895_p12 = scmp.ne.s32.totalorder %s762_s12, 0 }
 0x485   :  { %766 = shalt.err (%p895_p12)  }
 0x486   :  { %768 = vsyncmov [#allocation3 + $0x1] }
 0x489   :  { %s769_s15 = vpop.sfrf %768 }
 0x48a   :  { %p896_p9 = scmp.ne.s32.totalorder %s769_s15, 0 }
 0x48c   :  { %773 = shalt.err (%p896_p9)  }
 0x48d   :  { %775 = vsyncmov [#allocation3 + $0x2] }
 0x490   :  { %s776_s29 = vpop.sfrf %775 }
 0x491   :  { %p897_p10 = scmp.ne.s32.totalorder %s776_s29, 0 }
 0x493   :  { %780 = shalt.err (%p897_p10)  }
 0x494   :  { %782 = vsyncmov [#allocation3 + $0x3] }
 0x497   :  { %s783_s21 = vpop.sfrf %782 }
 0x498   :  { %p898_p11 = scmp.ne.s32.totalorder %s783_s21, 0 }
 0x49a   :  { %787 = shalt.err (%p898_p11)  }
 0x49b   :  { %789 = vsyncmov [#allocation3 + $0x4] }
 0x49e   :  { %s790_s27 = vpop.sfrf %789 }
 0x49f   :  { %p899_p1 = scmp.ne.s32.totalorder %s790_s27, 0 }
 0x4a1   :  { %794 = shalt.err (%p899_p1)  }
 0x4a2   :  { %796 = vsyncmov [#allocation3 + $0x5] }
 0x4a5   :  { %s797_s1 = vpop.sfrf %796 }
 0x4a6   :  { %p900_p3 = scmp.ne.s32.totalorder %s797_s1, 0 }
 0x4a8   :  { %801 = shalt.err (%p900_p3)  }
 0x4a9   :  { %803 = vsyncmov [#allocation3 + $0x6] }
 0x4ac   :  { %s804_s2 = vpop.sfrf %803 }
 0x4ad   :  { %p901_p5 = scmp.ne.s32.totalorder %s804_s2, 0 }
 0x4af   :  { %808 = shalt.err (%p901_p5)  }
 0x4b0   :  { %810 = vsyncmov [#allocation3 + $0x7] }
 0x4b3   :  { %s811_s3 = vpop.sfrf %810 }
 0x4b4   :  { %p902_p6 = scmp.ne.s32.totalorder %s811_s3, 0 }
 0x4b6   :  { %815 = shalt.err (%p902_p6)  }

</bundles_post_ra>
